<compile_context>
chip_gen: v6e
topology: v6e:2x2x1
jax: 0.10.0
libtpu: 0.0.40
codegen_flags: <defaults>
</compile_context>

<pallas_src>
import math

import jax
import jax.numpy as jnp
from jax.experimental import pallas as pl
from jax.experimental.pallas import tpu as pltpu

_H1 = 8  # ln1 output width (fixed by the module: nn.Linear(d_model, 8))


def _round_up(n, m):
    return (n + m - 1) // m * m


# --------------------------- primary fused kernel -----------------------------
# Block-diagonal W1 path: both GEMMs are lane-dense 2-D matmuls, no S loop.

def _fused_dense_kernel(x_ref, w1_ref, b1_ref, w2_ref, b2_ref, o_ref):
    # x:  (tb, S*D)        w1: (S*D, S*8)  block-diagonal     b1: (1, S*8) f32
    # w2: (S*8, C)         b2: (1, C) f32                      o: (tb, C)
    xv = x_ref[...].astype(w1_ref.dtype)
    h = jnp.dot(xv, w1_ref[...], preferred_element_type=jnp.float32)
    h = jax.nn.sigmoid(h + b1_ref[...])            # f32 VPU/EUP epilogue (v5e-safe)
    # TODO(synk): training-mode dropout (p=dropout) on h via pltpu.prng_*; identity at inference.
    out = jnp.dot(h.astype(w2_ref.dtype), w2_ref[...],
                  preferred_element_type=jnp.float32)
    o_ref[...] = (out + b2_ref[...]).astype(o_ref.dtype)


# ----------------------- fallback kernel (large S*D) --------------------------
# Same structure as the previous (known-lowering) version, with a small batch
# tile so the f32 accumulator stays comfortably inside the vreg file.

def _fused_looped_kernel(x_ref, w1_ref, b1_ref, w2_ref, b2_ref, o_ref):
    # x: (tb, S, D)   w1: (D, 8)   b1: (1, 8) f32   w2: (S, 8, C)   b2: (1, C) f32
    xv = x_ref[...]
    w1 = w1_ref[...]
    b1 = b1_ref[...]
    seq = xv.shape[1]
    acc = jnp.zeros(o_ref.shape, jnp.float32)
    for s in range(seq):
        h = jnp.dot(xv[:, s, :].astype(w1.dtype), w1,
                    preferred_element_type=jnp.float32) + b1
        h = jax.nn.sigmoid(h)
        acc = acc + jnp.dot(h.astype(w2_ref.dtype), w2_ref[s],
                            preferred_element_type=jnp.float32)
    o_ref[...] = (acc + b2_ref[...]).astype(o_ref.dtype)


# ----------------------------- tiling / wrappers ------------------------------

def _choose_batch_tile(B, per_row_bytes, resident_bytes, budget=24 * 1024 * 1024):
    """Sublane-aligned batch tile that fits the VMEM budget on v5e/v6e/v7x."""
    avail = max(budget - resident_bytes, 1 * 1024 * 1024)
    cap = (avail // max(per_row_bytes, 1)) // 8 * 8
    cap = max(8, min(cap, 2048))
    if B <= cap:
        if B >= 512 and B % 16 == 0:
            return B // 2          # >=2 grid steps -> both v7x TensorCores busy
        return B                   # single (or full-dim) block; always legal
    return cap                     # grid = cdiv(B, cap); ragged tail handled by Pallas


def _classifier_dense(x2d, w1big, b1r, w2f, b2r, out_dtype):
    """x2d: (B, S*D) -> (B, classes) via one fused pallas_call."""
    B, SD = x2d.shape
    H, C = w2f.shape
    x_isz = jnp.dtype(x2d.dtype).itemsize
    w_isz = jnp.dtype(w1big.dtype).itemsize

    per_row = 2 * _round_up(SD, 128) * x_isz + 2 * _round_up(C, 128) * 4
    resident = (SD * H + H * C) * w_isz + 4 * (H + C)
    tb = _choose_batch_tile(B, per_row, resident)
    nblk = pl.cdiv(B, tb)

    x_spec_kwargs = {}
    if nblk >= 4:
        # deeper input pipelining; only worthwhile (and only constructed) for long grids
        x_spec_kwargs["pipeline_mode"] = pl.Buffered(3)
    x_spec = pl.BlockSpec((tb, SD), lambda i: (i, 0), **x_spec_kwargs)

    flops = 2 * B * SD * H + 2 * B * H * C
    bytes_accessed = (B * SD * x_isz + B * C * jnp.dtype(out_dtype).itemsize
                      + (SD * H + H * C) * w_isz + 4 * (H + C))

    return pl.pallas_call(
        _fused_dense_kernel,
        out_shape=jax.ShapeDtypeStruct((B, C), out_dtype),
        grid_spec=pltpu.PrefetchScalarGridSpec(
            num_scalar_prefetch=0,
            grid=(nblk,),
            in_specs=[
                x_spec,                                      # tiled over batch
                pl.BlockSpec((SD, H), lambda i: (0, 0)),     # resident block-diag W1
                pl.BlockSpec((1, H), lambda i: (0, 0)),      # resident b1 (f32)
                pl.BlockSpec((H, C), lambda i: (0, 0)),      # resident W2 (S*8, C)
                pl.BlockSpec((1, C), lambda i: (0, 0)),      # resident b2 (f32)
            ],
            out_specs=pl.BlockSpec((tb, C), lambda i: (i, 0)),
        ),
        compiler_params=pltpu.CompilerParams(
            dimension_semantics=("parallel",),               # megacore sharding on v7x
            vmem_limit_bytes=64 * 1024 * 1024,
        ),
        cost_estimate=pl.CostEstimate(
            flops=int(flops),
            transcendentals=int(B * H),
            bytes_accessed=int(bytes_accessed),
        ),
    )(x2d, w1big, b1r, w2f, b2r)


def _classifier_looped(x, w1t, b1r, w2r, b2r, classes, out_dtype, *, max_tb=128):
    """Fallback: x: (B, S, D) -> (B, classes); per-s contraction, small batch tile."""
    B, S, D = x.shape
    tb = B if B <= max_tb else max_tb
    nblk = pl.cdiv(B, tb)
    x_isz = jnp.dtype(x.dtype).itemsize
    w_isz = jnp.dtype(w1t.dtype).itemsize

    flops = 2 * B * S * D * _H1 + 2 * B * S * _H1 * classes
    bytes_accessed = (B * S * D * x_isz + B * classes * 4
                      + (D * _H1 + S * _H1 * classes) * w_isz + 4 * (_H1 + classes))

    return pl.pallas_call(
        _fused_looped_kernel,
        out_shape=jax.ShapeDtypeStruct((B, classes), out_dtype),
        grid_spec=pltpu.PrefetchScalarGridSpec(
            num_scalar_prefetch=0,
            grid=(nblk,),
            in_specs=[
                pl.BlockSpec((tb, S, D), lambda i: (i, 0, 0)),
                pl.BlockSpec((D, _H1), lambda i: (0, 0)),
                pl.BlockSpec((1, _H1), lambda i: (0, 0)),
                pl.BlockSpec((S, _H1, classes), lambda i: (0, 0, 0)),
                pl.BlockSpec((1, classes), lambda i: (0, 0)),
            ],
            out_specs=pl.BlockSpec((tb, classes), lambda i: (i, 0)),
        ),
        compiler_params=pltpu.CompilerParams(
            dimension_semantics=("parallel",),
            vmem_limit_bytes=64 * 1024 * 1024,
        ),
        cost_estimate=pl.CostEstimate(
            flops=int(flops),
            transcendentals=int(B * S * _H1),
            bytes_accessed=int(bytes_accessed),
        ),
    )(x, w1t, b1r, w2r, b2r)


# -------------------------------- module wrapper -------------------------------

class ClassifierPallas:
    # use the block-diagonal path only while W1_big stays small (<= 8 MiB f32)
    _MAX_BLOCKDIAG_ELEMS = 2 * 1024 * 1024

    def __init__(self, input_dim, classes, dropout, d_model, key,
                 param_dtype=jnp.float32):
        assert input_dim % _H1 == 0, "input_dim must be seq_len * 8"
        self.input_dim = input_dim
        self.classes = classes
        self.dropout = dropout          # inference mode: dropout is identity
        self.d_model = d_model
        self.seq = input_dim // _H1

        k1, k2, k3, k4 = jax.random.split(key, 4)

        # ln1: Linear(d_model, 8), xavier_normal_ weight, default uniform bias
        std1 = math.sqrt(2.0 / (d_model + _H1))
        w1 = std1 * jax.random.normal(k1, (_H1, d_model), jnp.float32)
        bound1 = 1.0 / math.sqrt(d_model)
        b1 = jax.random.uniform(k2, (_H1,), jnp.float32, -bound1, bound1)

        # ln2: Linear(input_dim, classes), xavier_normal_ weight
        std2 = math.sqrt(2.0 / (input_dim + classes))
        w2 = std2 * jax.random.normal(k3, (classes, input_dim), jnp.float32)
        bound2 = 1.0 / math.sqrt(input_dim)
        b2 = jax.random.uniform(k4, (classes,), jnp.float32, -bound2, bound2)

        # raw copies for the pure-JAX reference
        self._w1, self._b1, self._w2, self._b2 = w1, b1, w2, b2

        # ---- kernel-friendly layouts, computed ONCE (hoisted out of __call__) ----
        S, D = self.seq, d_model
        self.b1f = b1.astype(jnp.float32)                         # epilogue biases stay f32
        self.b2f = b2.reshape(1, classes).astype(jnp.float32)

        self._dense = (S * D) * (S * _H1) <= self._MAX_BLOCKDIAG_ELEMS
        if self._dense:
            w1t = w1.T.astype(param_dtype)                        # (D, 8)
            w1big = jnp.zeros((S * D, S * _H1), param_dtype)      # block-diagonal W1
            for s in range(S):
                w1big = w1big.at[s * D:(s + 1) * D, s * _H1:(s + 1) * _H1].set(w1t)
            self.w1big = w1big                                    # (S*D, S*8)
            self.b1big = jnp.tile(self.b1f, S).reshape(1, S * _H1)
            self.w2f = w2.T.astype(param_dtype)                   # (S*8, classes)
        else:
            self.w1t = w1.T.astype(param_dtype)                   # (D, 8)
            self.b1r = self.b1f.reshape(1, _H1)                   # (1, 8)
            self.w2r = w2.T.reshape(S, _H1, classes).astype(param_dtype)  # (S, 8, C)

    def __call__(self, x):
        # x: (B, S, d_model)
        B, S, D = x.shape
        assert S == self.seq and D == self.d_model
        if self._dense:
            x2d = x.reshape(B, S * D)        # leading-dim collapse: free in XLA
            return _classifier_dense(x2d, self.w1big, self.b1big, self.w2f,
                                     self.b2f, x.dtype)
        return _classifier_looped(x, self.w1t, self.b1r, self.w2r, self.b2f,
                                  self.classes, x.dtype)

    # pure-JAX reference (mirrors the PyTorch forward) for verification
    def reference(self, x):
        B, S, D = x.shape
        h = jax.nn.sigmoid(x.reshape(B * S, D) @ self._w1.T + self._b1)
        flat = h.reshape(B, S * _H1)          # nn.Flatten(start_dim=1)
        return flat @ self._w2.T + self._b2


# ------------------------------------ main ------------------------------------

if __name__ == "__main__":
    key = jax.random.PRNGKey(0)
    kx, kp = jax.random.split(key)

    B, S, d_model = 2, 8, 32
    input_dim = S * _H1          # flatten of (S, 8)
    classes = 10
    dropout = 0.1

    x = jax.random.normal(kx, (B, S, d_model), jnp.float32)
    model = ClassifierPallas(input_dim, classes, dropout, d_model, kp)

    out = jax.block_until_ready(model(x))
    assert out.shape == (B, classes), out.shape

    ref = model.reference(x)
    max_err = float(jnp.max(jnp.abs(out - ref)))
    assert jnp.allclose(out, ref, atol=1e-4, rtol=1e-4), max_err

    print("KERNEL_OK")
</pallas_src>

<mosaic_0001>
module attributes {stable_mosaic.version = 11 : i64} {
  func.func @_fused_dense_kernel(%arg0: i32, %arg1: memref<2x256xf32, #tpu.memory_space<vmem>>, %arg2: memref<256x64xf32, #tpu.memory_space<vmem>>, %arg3: memref<1x64xf32, #tpu.memory_space<vmem>>, %arg4: memref<64x10xf32, #tpu.memory_space<vmem>>, %arg5: memref<1x10xf32, #tpu.memory_space<vmem>>, %arg6: memref<2x10xf32, #tpu.memory_space<vmem>>) attributes {dimension_semantics = [#tpu.dimension_semantics<parallel>], iteration_bounds = array<i64: 1>, scalar_prefetch = 0 : i64, scratch_operands = 0 : i64, tpu.core_type = #tpu.core_type<tc>, window_params = [{transform_indices = @transform_0, window_bounds = array<i64: 2, 256>}, {pipeline_mode = #tpu.pipeline_mode<synchronous>, transform_indices = @transform_1, window_bounds = array<i64: 256, 64>}, {pipeline_mode = #tpu.pipeline_mode<synchronous>, transform_indices = @transform_2, window_bounds = array<i64: 1, 64>}, {pipeline_mode = #tpu.pipeline_mode<synchronous>, transform_indices = @transform_3, window_bounds = array<i64: 64, 10>}, {pipeline_mode = #tpu.pipeline_mode<synchronous>, transform_indices = @transform_4, window_bounds = array<i64: 1, 10>}, {transform_indices = @transform_5, window_bounds = array<i64: 2, 10>}]} {
    %c0 = arith.constant 0 : index
    %c0_0 = arith.constant 0 : index
    %0 = vector.load %arg1[%c0, %c0_0] : memref<2x256xf32, #tpu.memory_space<vmem>>, vector<2x256xf32>
    %c0_1 = arith.constant 0 : index
    %c0_2 = arith.constant 0 : index
    %1 = vector.load %arg2[%c0_1, %c0_2] : memref<256x64xf32, #tpu.memory_space<vmem>>, vector<256x64xf32>
    %cst = arith.constant dense<0.000000e+00> : vector<2x64xf32>
    %2 = tpu.matmul %0, %1, %cst {dimension_numbers = #tpu.dot_dimension_numbers<[1], [0], [0], [1], [0, 0, 1, 1], [], []>} : vector<2x256xf32>, vector<256x64xf32>, vector<2x64xf32> -> vector<2x64xf32>
    %c0_3 = arith.constant 0 : index
    %c0_4 = arith.constant 0 : index
    %3 = vector.load %arg3[%c0_3, %c0_4] : memref<1x64xf32, #tpu.memory_space<vmem>>, vector<1x64xf32>
    %4 = vector.broadcast %3 : vector<1x64xf32> to vector<2x64xf32>
    %5 = arith.addf %2, %4 : vector<2x64xf32>
    %6 = arith.negf %5 : vector<2x64xf32>
    %7 = math.exp %6 : vector<2x64xf32>
    %cst_5 = arith.constant 1.000000e+00 : f32
    %8 = vector.broadcast %cst_5 : f32 to vector<2x64xf32>
    %9 = arith.addf %8, %7 : vector<2x64xf32>
    %10 = arith.divf %8, %9 : vector<2x64xf32>
    %c0_6 = arith.constant 0 : index
    %c0_7 = arith.constant 0 : index
    %11 = vector.load %arg4[%c0_6, %c0_7] : memref<64x10xf32, #tpu.memory_space<vmem>>, vector<64x10xf32>
    %cst_8 = arith.constant dense<0.000000e+00> : vector<2x10xf32>
    %12 = tpu.matmul %10, %11, %cst_8 {dimension_numbers = #tpu.dot_dimension_numbers<[1], [0], [0], [1], [0, 0, 1, 1], [], []>} : vector<2x64xf32>, vector<64x10xf32>, vector<2x10xf32> -> vector<2x10xf32>
    %c0_9 = arith.constant 0 : index
    %c0_10 = arith.constant 0 : index
    %13 = vector.load %arg5[%c0_9, %c0_10] : memref<1x10xf32, #tpu.memory_space<vmem>>, vector<1x10xf32>
    %14 = vector.broadcast %13 : vector<1x10xf32> to vector<2x10xf32>
    %15 = arith.addf %12, %14 : vector<2x10xf32>
    %c0_11 = arith.constant 0 : index
    %c0_12 = arith.constant 0 : index
    %16 = vector.load %arg6[%c0_11, %c0_12] : memref<2x10xf32, #tpu.memory_space<vmem>>, vector<2x10xf32>
    tpu.vector_store %arg6[%c0_11, %c0_12], %15 {strides = array<i32>} : memref<2x10xf32, #tpu.memory_space<vmem>>, vector<2x10xf32>,
    return
  }
  func.func @transform_0(%arg0: i32) -> (i32, i32) {
    %c0_i32 = arith.constant 0 : i32
    %c0_i32_0 = arith.constant 0 : i32
    return %arg0, %c0_i32 : i32, i32
  }
  func.func @transform_1(%arg0: i32) -> (i32, i32) {
    %c0_i32 = arith.constant 0 : i32
    %c0_i32_0 = arith.constant 0 : i32
    %c0_i32_1 = arith.constant 0 : i32
    return %c0_i32, %c0_i32_0 : i32, i32
  }
  func.func @transform_2(%arg0: i32) -> (i32, i32) {
    %c0_i32 = arith.constant 0 : i32
    %c0_i32_0 = arith.constant 0 : i32
    %c0_i32_1 = arith.constant 0 : i32
    return %c0_i32, %c0_i32_0 : i32, i32
  }
  func.func @transform_3(%arg0: i32) -> (i32, i32) {
    %c0_i32 = arith.constant 0 : i32
    %c0_i32_0 = arith.constant 0 : i32
    %c0_i32_1 = arith.constant 0 : i32
    return %c0_i32, %c0_i32_0 : i32, i32
  }
  func.func @transform_4(%arg0: i32) -> (i32, i32) {
    %c0_i32 = arith.constant 0 : i32
    %c0_i32_0 = arith.constant 0 : i32
    %c0_i32_1 = arith.constant 0 : i32
    return %c0_i32, %c0_i32_0 : i32, i32
  }
  func.func @transform_5(%arg0: i32) -> (i32, i32) {
    %c0_i32 = arith.constant 0 : i32
    %c0_i32_0 = arith.constant 0 : i32
    return %arg0, %c0_i32 : i32, i32
  }
}

</mosaic_0001>

<bundles_post_ra>
// kernel: tpu_custom_call.1
= control target key start
LH: loop header
LB: loop body
LE: loop exit
PB: predicated region body
PF: predicated region fallthrough
CT: control target
= control target key end

     0   :  { %s515_s0 = inlined_call_operand.vmem [shape: f32[2,256], index: 0, kind: input, shape index: {}]   ;;  %s516_s1 = inlined_call_operand.vmem [shape: f32[256,64], index: 1, kind: input, shape index: {}]   ;;  %s517_s2 = inlined_call_operand.vmem [shape: f32[1,64], index: 2, kind: input, shape index: {}]   ;;  %s518_s3 = inlined_call_operand.vmem [shape: f32[64,10], index: 3, kind: input, shape index: {}]   ;;  %s519_s4 = inlined_call_operand.vmem [shape: f32[1,10], index: 4, kind: input, shape index: {}]   ;;  %s520_s5 = inlined_call_operand.hbm [shape: f32[2,10], index: 5, kind: output, shape index: {}]  }
   0x1   :  { %v53_v0 = vld [vmem:[%s516_s1 + $0xf8] sm:$0xff]  ;;  %v52_v2 = vld [vmem:[%s516_s1 + $0xf0] sm:$0xff]  ;;  %v51_v4 = vld [vmem:[%s516_s1 + $0xe8] sm:$0xff] }
   0x2   :  { %v37_v1 = vld [vmem:[%s516_s1 + $0x78] sm:$0xff]  ;;  %258 = vmatprep.subr.mxu0 %v53_v0  ;;  %v36_v3 = vld [vmem:[%s516_s1 + $0x70] sm:$0xff]  ;;  %v35_v5 = vld [vmem:[%s516_s1 + $0x68] sm:$0xff] }
   0x3   :  { %259 = vmatpush3.msra.mxu0 %v37_v1  ;;  %v50_v6 = vld [vmem:[%s516_s1 + $0xe0] sm:$0xff]  ;;  %v49_v8 = vld [vmem:[%s516_s1 + $0xd8] sm:$0xff]  ;;  %v48_v10 = vld [vmem:[%s516_s1 + $0xd0] sm:$0xff] }
   0x4   :  { %260 = vmatprep.subr.mxu0 %v52_v2  ;;  %v34_v7 = vld [vmem:[%s516_s1 + $0x60] sm:$0xff]  ;;  %v33_v9 = vld [vmem:[%s516_s1 + $0x58] sm:$0xff]  ;;  %v32_v11 = vld [vmem:[%s516_s1 + $0x50] sm:$0xff] }
   0x5   :  { %261 = vmatpush3.msra.mxu0 %v36_v3  ;;  %v47_v12 = vld [vmem:[%s516_s1 + $0xc8] sm:$0xff]  ;;  %v254_v13 = vld.sshfl [vmem:[%s515_s0] sm:$0x33 pattern:$0x76325410] }
   0x6   :  { %262 = vmatprep.subr.mxu0 %v51_v4  ;;  %v31_v14 = vld [vmem:[%s516_s1 + $0x48] sm:$0xff]  ;;  %v69_v15 = vcombine.high %v254_v13, %v254_v13 }
   0x7   :  { %263 = vmatpush3.msra.mxu0 %v35_v5 }
   0x8   :  { %264 = vmatprep.subr.mxu0 %v50_v6 }
   0x9   :  { %265 = vmatpush3.msra.mxu0 %v34_v7 }
   0xa   :  { %266 = vmatprep.subr.mxu0 %v49_v8 }
   0xb   :  { %267 = vmatpush3.msra.mxu0 %v33_v9 }
   0xc   :  { %268 = vmatprep.subr.mxu0 %v48_v10 }
   0xd   :  { %10 = vsyncpa [#allocation3], 0  ;;  %269 = vmatpush3.msra.mxu0 %v32_v11  ;;  %v46_v16 = vld [vmem:[%s516_s1 + $0xc0] sm:$0xff]  ;;  %136 = vmatprep.mubr.f32.mxu0 %v69_v15  ;;  %v45_v18 = vld [vmem:[%s516_s1 + $0xb8] sm:$0xff]  ;;  %v350_v34 = vmov 0.0   ;;  %vm351_vm0 = vmmov 0  }
   0xe   :  { %270 = vmatprep.subr.mxu0 %v47_v12  ;;  %v30_v17 = vld [vmem:[%s516_s1 + $0x40] sm:$0xff]  ;;  %v29_v19 = vld [vmem:[%s516_s1 + $0x38] sm:$0xff]  ;;  %v44_v20 = vld [vmem:[%s516_s1 + $0xb0] sm:$0xff]  ;;  %302 = vmatprep.subr.mxu1 %v350_v34  ;;  %vm163_vm1 = vcmask 523264   ;;  %s352_s25 = smov [#allocation2]   ;;  %vm237_vm2 = vcmask 74752  }
   0xf   :  { %271 = vmatpush3.msra.mxu0 %v31_v14  ;;  %v28_v21 = vld [vmem:[%s516_s1 + $0x30] sm:$0xff]  ;;  %v43_v22 = vld [vmem:[%s516_s1 + $0xa8] sm:$0xff]  ;;  %v42_v24 = vld [vmem:[%s516_s1 + $0xa0] sm:$0xff]  ;;  %318 = vmatprep.mubr.msk.f32.mxu1 %vm351_vm0, %v350_v34  ;;  %s245_s26 = sshll.u32 %s352_s25, 4  ;;  %s246_s26 = int_to_ptr.vmem [resolvable:$true] %s245_s26 }
  0x10   :  { %272 = vmatprep.subr.mxu0 %v46_v16  ;;  %v27_v23 = vld [vmem:[%s516_s1 + $0x28] sm:$0xff]  ;;  %v26_v25 = vld [vmem:[%s516_s1 + $0x20] sm:$0xff]  ;;  %v41_v26 = vld [vmem:[%s516_s1 + $0x98] sm:$0xff]  ;;  %p333_p1 = scmp.lt.s32.totalorder %s246_s26, %s246_s26 }
  0x11   :  { %273 = vmatpush3.msra.mxu0 %v30_v17  ;;  %v25_v27 = vld [vmem:[%s516_s1 + $0x18] sm:$0xff]  ;;  %v40_v28 = vld [vmem:[%s516_s1 + $0x90] sm:$0xff]  ;;  %v39_v30 = vld [vmem:[%s516_s1 + $0x88] sm:$0xff] }
  0x12   :  { %274 = vmatprep.subr.mxu0 %v45_v18  ;;  %v24_v29 = vld [vmem:[%s516_s1 + $0x10] sm:$0xff]  ;;  %v23_v31 = vld [vmem:[%s516_s1 + $0x8] sm:$0xff]  ;;  %v38_v32 = vld [vmem:[%s516_s1 + $0x80] sm:$0xff] }
  0x13   :  { %275 = vmatpush3.msra.mxu0 %v29_v19  ;;  %v22_v33 = vld [vmem:[%s516_s1] sm:$0xff]  ;;  %v155_v35 = vld [vmem:[%s518_s3 + $0x38] sm:$0xff]  ;;  %v154_v36 = vld [vmem:[%s518_s3 + $0x30] sm:$0xff] }
  0x14   :  { %276 = vmatprep.subr.mxu0 %v44_v20  ;;  %303 = vmatpush3.msra.mxu1 %v155_v35  ;;  %v153_v37 = vld [vmem:[%s518_s3 + $0x28] sm:$0xff]  ;;  %v152_v38 = vld [vmem:[%s518_s3 + $0x20] sm:$0xff]  ;;  %v151_v39 = vld [vmem:[%s518_s3 + $0x18] sm:$0xff] }
  0x15   :  { %277 = vmatpush3.msra.mxu0 %v28_v21  ;;  %304 = vmatprep.subr.mxu1 %v350_v34  ;;  %v150_v40 = vld [vmem:[%s518_s3 + $0x10] sm:$0xff]  ;;  %v149_v41 = vld [vmem:[%s518_s3 + $0x8] sm:$0xff]  ;;  %v148_v42 = vld [vmem:[%s518_s3] sm:$0xff] }
  0x16   :  { %278 = vmatprep.subr.mxu0 %v43_v22  ;;  %305 = vmatpush3.msra.mxu1 %v154_v36  ;;  %v253_v44 = vld [vmem:[%s517_s2] ss:$0 sm:$0xff]  ;;  %s328_s2 = scalar_lea.vmem %s246_s26, 32 }
  0x17   :  { %279 = vmatpush3.msra.mxu0 %v27_v23  ;;  %306 = vmatprep.subr.mxu1 %v350_v34  ;;  %v256_v52 = vld [vmem:[%s519_s4] ss:$0 sm:$0xff]  ;;  %p329_p0 = scmp.ne.s32.totalorder %s246_s26, %s328_s2  ;;  %p334_p2 = scmp.lt.s32.totalorder %s328_s2, %s328_s2 }
  0x18   :  { %280 = vmatprep.subr.mxu0 %v42_v24  ;;  %307 = vmatpush3.msra.mxu1 %v153_v37 }
  0x19   :  { %281 = vmatpush3.msra.mxu0 %v26_v25  ;;  %308 = vmatprep.subr.mxu1 %v350_v34  ;;  %p335_p3 = por %p334_p2, %p333_p1 }
  0x1a   :  { %282 = vmatprep.subr.mxu0 %v41_v26  ;;  %309 = vmatpush3.msra.mxu1 %v152_v38 }
  0x1b   :  { %283 = vmatpush3.msra.mxu0 %v25_v27  ;;  %310 = vmatprep.subr.mxu1 %v350_v34  ;;  %p336_p4 = pnand %p335_p3, %p329_p0 }
  0x1c   :  { %284 = vmatprep.subr.mxu0 %v40_v28  ;;  %311 = vmatpush3.msra.mxu1 %v151_v39 }
  0x1d   :  { %285 = vmatpush3.msra.mxu0 %v24_v29  ;;  %312 = vmatprep.subr.mxu1 %v350_v34 }
  0x1e   :  { %286 = vmatprep.subr.mxu0 %v39_v30  ;;  %313 = vmatpush3.msra.mxu1 %v150_v40 }
  0x1f   :  { %287 = vmatpush3.msra.mxu0 %v23_v31  ;;  %314 = vmatprep.subr.mxu1 %v350_v34 }
  0x20   :  { %288 = vmatprep.subr.mxu0 %v38_v32  ;;  %315 = vmatpush3.msra.mxu1 %v149_v41 }
  0x21   :  { %289 = vmatpush3.msra.mxu0 %v22_v33  ;;  %316 = vmatprep.subr.mxu1 %v350_v34 }
  0x22   :  { %137 = vmatmul.mubr.f32.vlgmr.msra.gmra.mxu0 %v254_v13  ;;  %317 = vmatpush3.msra.mxu1 %v148_v42 }
  0xe2   :  { %v290_v43 = vpop.f32.mrf.mxu0 }
  0xe4   :  { %v291_v45 = vpop.f32.mrf.mxu0 }
  0xe5   :  { %v292_v46 = vadd.f32 %v291_v45, %v290_v43 }
  0xe7   :  { %v139_v47 = vadd.f32 %v292_v46, %v253_v44 }
  0xe9   :  { %v255_v48 = vmul.f32 -1.442695, %v139_v47 }
  0xeb   :  { %324 = vpow2.f32 %v255_v48 }
  0xf8   :  { %v325_v49 = vpop.eup %324 }
  0xf9   :  { %v145_v50 = vadd.f32 1.0, %v325_v49 }
  0xfb   :  { %326 = vrcp.f32 %v145_v50 }
 0x108   :  { %v327_v51 = vpop.eup %326 }
 0x109   :  { %319 = vmatmul.mubr.msk.f32.vlgmr.msra.gmra.mxu1 %vm163_vm1, %v327_v51 }
 0x1c9   :  { %v233_v53 = vpop.f32.mrf.mxu1 }
 0x1ca   :  { %v234_v54 = vadd.f32 %v256_v52, %v233_v53 }
 0x1cb   :  { %v320_v55 = vpop.f32.mrf.mxu1 }
 0x1cc   :  { %238 = vst.msk [vmem:[#allocation2] sm:$0x3] %vm237_vm2, %v234_v54 }
 0x1cd   :  { %339 = shalt.err (!%p336_p4)
}
 0x1ce   :  { %248 = dma.vmem_to_hbm [thread:$0]  %s246_s26, 32, %s520_s5, [#allocation3]  }
 0x1cf   :  { %348 = dma.done.wait [#allocation3], 32  }
 0x1d0   :  { %349 = vsyncadd [#allocation3], 4294967264 }
 0x1d1   :  { %252 = vsyncpa [#allocation3], 1 }

</bundles_post_ra>
